<compile_context>
chip_gen: v5e
topology: v5e:2x2
jax: 0.10.0
libtpu: 0.0.40
codegen_flags: <defaults>
</compile_context>

<pallas_src>
import jax
import jax.numpy as jnp
from jax.experimental import pallas as pl
from jax.experimental.pallas import tpu as pltpu


def _round_up(n, m):
    return ((n + m - 1) // m) * m


def _sub_tile(dim, single_max, tile):
    """Tile size / padded extent for a sublane-side axis (multiple of 8)."""
    d8 = _round_up(dim, 8)
    if d8 <= single_max:
        return d8, d8                      # single block covers the whole axis
    return tile, _round_up(dim, tile)


def _lane_tile(dim):
    """Tile size / padded extent for the lane axis (multiple of 128)."""
    d128 = _round_up(dim, 128)
    for t in (512, 256, 128):
        if d128 % t == 0:
            return t, d128
    return 128, d128


def _build_pool_matrix(L, L_out, kernel_size, stride, pad, dtype):
    """Banded (L_out, L) matrix: replicate-pad + window mean folded together.

    A[i, j] = (# taps of output window i landing on input row j after
               clamping to [0, L-1]) / kernel_size
    """
    if L == 1:
        return jnp.ones((L_out, 1), dtype)
    i = jnp.arange(L_out, dtype=jnp.int32)[:, None]          # (L_out, 1)
    j = jnp.arange(L, dtype=jnp.int32)[None, :]               # (1, L)
    lo = i * stride - pad                                      # first (unclipped) tap
    hi = lo + (kernel_size - 1)                                # last  (unclipped) tap
    cnt_inner = jnp.logical_and(j >= lo, j <= hi).astype(jnp.int32)
    cnt_first = jnp.clip(jnp.minimum(hi, 0) - lo + 1, 0, kernel_size)
    cnt_last = jnp.clip(hi - jnp.maximum(lo, L - 1) + 1, 0, kernel_size)
    cnt = jnp.where(j == 0, cnt_first,
                    jnp.where(j == L - 1, cnt_last, cnt_inner))
    return (cnt.astype(jnp.float32) / float(kernel_size)).astype(dtype)


def _pool_matmul_kernel(kb_ref, a_ref, x_ref, o_ref, acc_ref):
    # kb_ref: SMEM band-start table (consumed by the index_maps; unused here).
    # a_ref: (TM, TK) averaging-matrix tile; x_ref: (TK, TN) time x lane slab.
    del kb_ref

    @pl.when(pl.program_id(2) == 0)
    def _():
        acc_ref[...] = jnp.zeros_like(acc_ref)

    acc_ref[...] += jnp.dot(a_ref[...], x_ref[...],
                            preferred_element_type=jnp.float32)

    @pl.when(pl.program_id(2) == pl.num_programs(2) - 1)
    def _():
        o_ref[...] = acc_ref[...].astype(o_ref.dtype)


def moving_avg_pallas(x, kernel_size, stride):
    """x: (B, L, C) -> (B, L_out, C), matching the PyTorch moving_avg module."""
    B, L, C = x.shape
    pad = (kernel_size - 1) // 2
    L_padded = L + 2 * pad
    assert L_padded >= kernel_size, "kernel_size too large for this sequence"
    L_out = (L_padded - kernel_size) // stride + 1

    # Lane-dense slab: time on sublanes, batch*channels on lanes.
    N = B * C
    x2 = jnp.transpose(x, (1, 0, 2)).reshape(L, N)

    TM, Mp = _sub_tile(L_out, single_max=256, tile=256)    # output-time tile
    TK, Kp = _sub_tile(L, single_max=1024, tile=256)       # input-time tile
    TN, Np = _lane_tile(N)                                 # lane tile (>=128)

    # Zero-pad to tile multiples: extra A rows/cols are zero, extra x rows hit
    # zero A columns, extra lanes are sliced off below -> no semantic change.
    x2 = jnp.pad(x2, ((0, Kp - L), (0, Np - N)))
    A = _build_pool_matrix(L, L_out, kernel_size, stride, pad, x.dtype)
    A = jnp.pad(A, ((0, Mp - L_out), (0, Kp - L)))

    n_i = Mp // TM
    n_k = Kp // TK

    # Static band extents per output-time block: which K blocks can hold
    # nonzero averaging weights.  Blocks visited outside a row-block's true
    # band (due to the uniform KB trip count / clamping) contain only zeros
    # in A for those rows, so they contribute nothing.
    first_blk, last_blk = [], []
    for i in range(n_i):
        lo = max(0, min(L - 1, i * TM * stride - pad))
        hi = max(0, min(L - 1, (i * TM + TM - 1) * stride - pad + kernel_size - 1))
        first_blk.append(lo // TK)
        last_blk.append(hi // TK)
    KB = max(l - f + 1 for f, l in zip(first_blk, last_blk))
    kb_starts = jnp.asarray([min(f, n_k - KB) for f in first_blk], dtype=jnp.int32)

    grid = (n_i, Np // TN, KB)

    out2 = pl.pallas_call(
        _pool_matmul_kernel,
        out_shape=jax.ShapeDtypeStruct((Mp, Np), x.dtype),
        grid_spec=pltpu.PrefetchScalarGridSpec(
            num_scalar_prefetch=1,
            grid=grid,
            in_specs=[
                pl.BlockSpec((TM, TK), lambda i, j, k, kb: (i, kb[i] + k)),
                pl.BlockSpec((TK, TN), lambda i, j, k, kb: (kb[i] + k, j)),
            ],
            out_specs=pl.BlockSpec((TM, TN), lambda i, j, k, kb: (i, j)),
            scratch_shapes=[pltpu.VMEM((TM, TN), jnp.float32)],
        ),
        compiler_params=pltpu.CompilerParams(
            dimension_semantics=("parallel", "parallel", "arbitrary"),
            vmem_limit_bytes=32 * 1024 * 1024,
        ),
    )(kb_starts, A, x2)

    out2 = out2[:L_out, :N]
    return jnp.transpose(out2.reshape(L_out, B, C), (1, 0, 2))


def _moving_avg_ref(x, kernel_size, stride):
    # Pure-JAX reference mirroring the PyTorch module.
    pad = (kernel_size - 1) // 2
    front = jnp.repeat(x[:, 0:1, :], pad, axis=1)
    end = jnp.repeat(x[:, -1:, :], pad, axis=1)
    xp = jnp.concatenate([front, x, end], axis=1)          # (B, L+2p, C)
    L_pad = xp.shape[1]
    L_out = (L_pad - kernel_size) // stride + 1
    idx = jnp.arange(L_out) * stride
    taps = jnp.stack([xp[:, idx + k, :] for k in range(kernel_size)], axis=0)
    return jnp.mean(taps, axis=0)


if __name__ == "__main__":
    # Primary small case (typical module usage; single-block fast path).
    B, L, C = 2, 16, 32
    kernel_size, stride = 5, 1
    x = jax.random.normal(jax.random.PRNGKey(0), (B, L, C), dtype=jnp.float32)

    out = jax.block_until_ready(moving_avg_pallas(x, kernel_size, stride))
    ref = _moving_avg_ref(x, kernel_size, stride)
    assert out.shape == ref.shape, (out.shape, ref.shape)
    assert jnp.allclose(out, ref, atol=1e-4, rtol=1e-4), float(
        jnp.max(jnp.abs(out - ref)))

    # Longer sequence with stride > 1: exercises the banded-K / scalar-prefetch
    # path (multiple output-time and input-time blocks, KB < n_k).
    B2, L2, C2 = 2, 1536, 16
    ks2, st2 = 25, 2
    x_long = jax.random.normal(jax.random.PRNGKey(1), (B2, L2, C2),
                               dtype=jnp.float32)
    out_long = jax.block_until_ready(moving_avg_pallas(x_long, ks2, st2))
    ref_long = _moving_avg_ref(x_long, ks2, st2)
    assert out_long.shape == ref_long.shape, (out_long.shape, ref_long.shape)
    assert jnp.allclose(out_long, ref_long, atol=1e-4, rtol=1e-4), float(
        jnp.max(jnp.abs(out_long - ref_long)))

    print("KERNEL_OK")
</pallas_src>

<mosaic_0001>
module attributes {stable_mosaic.version = 11 : i64} {
  func.func @_pool_matmul_kernel(%arg0: i32, %arg1: i32, %arg2: i32, %arg3: memref<1xi32, #tpu.memory_space<smem>>, %arg4: memref<16x16xf32, #tpu.memory_space<vmem>>, %arg5: memref<16x128xf32, #tpu.memory_space<vmem>>, %arg6: memref<16x128xf32, #tpu.memory_space<vmem>>, %arg7: memref<16x128xf32, #tpu.memory_space<vmem>>) attributes {dimension_semantics = [#tpu.dimension_semantics<parallel>, #tpu.dimension_semantics<parallel>, #tpu.dimension_semantics<arbitrary>], iteration_bounds = array<i64: 1, 1, 1>, scalar_prefetch = 1 : i64, scratch_operands = 1 : i64, tpu.core_type = #tpu.core_type<tc>, window_params = [{transform_indices = @transform_0, window_bounds = array<i64: 16, 16>}, {transform_indices = @transform_1, window_bounds = array<i64: 16, 128>}, {transform_indices = @transform_2, window_bounds = array<i64: 16, 128>}]} {
    %c0_i32 = arith.constant 0 : i32
    %0 = arith.cmpi eq, %arg2, %c0_i32 : i32
    %1 = arith.extui %0 : i1 to i32
    %c0_i32_0 = arith.constant 0 : i32
    %2 = arith.cmpi ne, %1, %c0_i32_0 : i32
    scf.if %2 {
      %cst_10 = arith.constant 0.000000e+00 : f32
      %12 = vector.broadcast %cst_10 : f32 to vector<16x128xf32>
      %c0_11 = arith.constant 0 : index
      %c0_12 = arith.constant 0 : index
      %13 = vector.load %arg7[%c0_11, %c0_12] : memref<16x128xf32, #tpu.memory_space<vmem>>, vector<16x128xf32>
      tpu.vector_store %arg7[%c0_11, %c0_12], %12 {strides = array<i32>} : memref<16x128xf32, #tpu.memory_space<vmem>>, vector<16x128xf32>,
    } else {
    }
    %c0 = arith.constant 0 : index
    %c0_1 = arith.constant 0 : index
    %3 = vector.load %arg7[%c0, %c0_1] : memref<16x128xf32, #tpu.memory_space<vmem>>, vector<16x128xf32>
    %c0_2 = arith.constant 0 : index
    %c0_3 = arith.constant 0 : index
    %4 = vector.load %arg4[%c0_2, %c0_3] : memref<16x16xf32, #tpu.memory_space<vmem>>, vector<16x16xf32>
    %c0_4 = arith.constant 0 : index
    %c0_5 = arith.constant 0 : index
    %5 = vector.load %arg5[%c0_4, %c0_5] : memref<16x128xf32, #tpu.memory_space<vmem>>, vector<16x128xf32>
    %cst = arith.constant dense<0.000000e+00> : vector<16x128xf32>
    %6 = tpu.matmul %4, %5, %cst {dimension_numbers = #tpu.dot_dimension_numbers<[1], [0], [0], [1], [0, 0, 1, 1], [], []>} : vector<16x16xf32>, vector<16x128xf32>, vector<16x128xf32> -> vector<16x128xf32>
    %7 = arith.addf %3, %6 : vector<16x128xf32>
    %c0_6 = arith.constant 0 : index
    %c0_7 = arith.constant 0 : index
    %8 = vector.load %arg7[%c0_6, %c0_7] : memref<16x128xf32, #tpu.memory_space<vmem>>, vector<16x128xf32>
    tpu.vector_store %arg7[%c0_6, %c0_7], %7 {strides = array<i32>} : memref<16x128xf32, #tpu.memory_space<vmem>>, vector<16x128xf32>,
    %c0_i32_8 = arith.constant 0 : i32
    %9 = arith.cmpi eq, %arg2, %c0_i32_8 : i32
    %10 = arith.extui %9 : i1 to i32
    %c0_i32_9 = arith.constant 0 : i32
    %11 = arith.cmpi ne, %10, %c0_i32_9 : i32
    scf.if %11 {
      %c0_10 = arith.constant 0 : index
      %c0_11 = arith.constant 0 : index
      %12 = vector.load %arg7[%c0_10, %c0_11] : memref<16x128xf32, #tpu.memory_space<vmem>>, vector<16x128xf32>
      %c0_12 = arith.constant 0 : index
      %c0_13 = arith.constant 0 : index
      %13 = vector.load %arg6[%c0_12, %c0_13] : memref<16x128xf32, #tpu.memory_space<vmem>>, vector<16x128xf32>
      tpu.vector_store %arg6[%c0_12, %c0_13], %12 {strides = array<i32>} : memref<16x128xf32, #tpu.memory_space<vmem>>, vector<16x128xf32>,
    } else {
    }
    return
  }
  func.func @transform_0(%arg0: i32, %arg1: i32, %arg2: i32, %arg3: memref<1xi32, #tpu.memory_space<smem>>) -> (i32, i32) {
    %0 = arith.index_cast %arg0 : i32 to index
    %1 = memref.load %arg3[%0] : memref<1xi32, #tpu.memory_space<smem>>
    %2 = arith.addi %1, %arg2 : i32
    %c0_i32 = arith.constant 0 : i32
    return %arg0, %2 : i32, i32
  }
  func.func @transform_1(%arg0: i32, %arg1: i32, %arg2: i32, %arg3: memref<1xi32, #tpu.memory_space<smem>>) -> (i32, i32) {
    %0 = arith.index_cast %arg0 : i32 to index
    %1 = memref.load %arg3[%0] : memref<1xi32, #tpu.memory_space<smem>>
    %2 = arith.addi %1, %arg2 : i32
    %c0_i32 = arith.constant 0 : i32
    return %2, %arg1 : i32, i32
  }
  func.func @transform_2(%arg0: i32, %arg1: i32, %arg2: i32, %arg3: memref<1xi32, #tpu.memory_space<smem>>) -> (i32, i32) {
    %c0_i32 = arith.constant 0 : i32
    return %arg0, %arg1 : i32, i32
  }
}

</mosaic_0001>

<bundles_post_ra>
// kernel: tpu_custom_call.1
= control target key start
LH: loop header
LB: loop body
LE: loop exit
PB: predicated region body
PF: predicated region fallthrough
CT: control target
= control target key end

     0   :  { %9 = vsyncpa [#allocation6], 0  ;;  %s289_s0 = inlined_call_operand.<no memory space> [shape: s32[1], index: 0, kind: input, shape index: {}]   ;;  %s290_s1 = inlined_call_operand.hbm [shape: f32[16,16], index: 1, kind: input, shape index: {}]   ;;  %s291_s2 = inlined_call_operand.hbm [shape: f32[16,128], index: 2, kind: input, shape index: {}]   ;;  %s292_s3 = inlined_call_operand.hbm [shape: f32[16,128], index: 3, kind: output, shape index: {}]  }
   0x1   :  { %10 = vsyncpa [#allocation9], 0 }
   0x2   :  { %11 = vsyncpa [#allocation7], 0  ;;  %s137_s14 = sshll.u32 %s289_s0, 3  ;;  %s228_s18 = smov [#allocation5]  }
   0x3   :  { %s19_s17 = scalar_lea.hbm %s290_s1, %s137_s14  ;;  %s22_s19 = sshll.u32 %s228_s18, 4  ;;  %s23_s19 = int_to_ptr.vmem [resolvable:$true] %s22_s19 }
   0x4   :  { %s20_s20 = sshll.u32 %s19_s17, 4  ;;  %s142_s23 = sshll.u32 %s289_s0, 4  ;;  %s21_s20 = int_to_ptr.hbm [resolvable:$true] %s20_s20 }
   0x5   :  { %s150_s24 = sshra.s32 %s21_s20, 4  ;;  %s154_s28 = scalar_lea.hbm %s290_s1, 16  ;;  %s151_s24 = int_to_ptr.hbm [resolvable:$true] %s150_s24 }
   0x6   :  { %s152_s25 = scalar_lea.hbm %s151_s24, 16  ;;  %p155_p1 = scmp.lt.s32.totalorder %s151_s24, %s290_s1 }
   0x7   :  { %p153_p0 = scmp.ne.s32.totalorder %s151_s24, %s152_s25  ;;  %p156_p2 = scmp.lt.s32.totalorder %s154_s28, %s152_s25 }
   0x9   :  { %p157_p3 = por %p156_p2, %p155_p1 }
   0xb   :  { %p158_p4 = pnand %p157_p3, %p153_p0 }
   0xd   :  { %161 = shalt.err (!%p158_p4)
}
   0xe   :  { %s229_s4 = smov 128   ;;  %s230_s5 = smov 8  }
   0xf   :  { %28 = dma.hbm_to_vmem [thread:$0]  %s21_s20, 256, %s23_s19, [#allocation6], %s229_s4, %s229_s4, %s230_s5  }
  0x10   :  { %s37_s7 = scalar_lea.hbm %s291_s2, %s142_s23  ;;  %s231_s9 = smov [#allocation8]  }
  0x11   :  { %s38_s8 = sshll.u32 %s37_s7, 4  ;;  %s40_s10 = sshll.u32 %s231_s9, 4  ;;  %s39_s8 = int_to_ptr.hbm [resolvable:$true] %s38_s8  ;;  %s41_s10 = int_to_ptr.vmem [resolvable:$true] %s40_s10 }
  0x12   :  { %s174_s1 = sshra.s32 %s39_s8, 4  ;;  %s178_s14 = scalar_lea.hbm %s291_s2, 16  ;;  %s175_s1 = int_to_ptr.hbm [resolvable:$true] %s174_s1 }
  0x13   :  { %s176_s11 = scalar_lea.hbm %s175_s1, 16  ;;  %p179_p6 = scmp.lt.s32.totalorder %s175_s1, %s291_s2 }
  0x14   :  { %p177_p5 = scmp.ne.s32.totalorder %s175_s1, %s176_s11  ;;  %p180_p7 = scmp.lt.s32.totalorder %s178_s14, %s176_s11 }
  0x16   :  { %p181_p8 = por %p180_p7, %p179_p6 }
  0x18   :  { %p182_p9 = pnand %p181_p8, %p177_p5 }
  0x1a   :  { %185 = shalt.err (!%p182_p9)
}
  0x1b   :  { %46 = dma.hbm_to_vmem [thread:$0]  %s39_s8, 256, %s41_s10, [#allocation9], %s229_s4, %s229_s4, %s230_s5  }
  0x1c   :  { %222 = dma.done.wait [#allocation6], 256  }
  0x1d   :  { %223 = vsyncadd [#allocation6], 4294967040 }
  0x1e   :  { %224 = dma.done.wait [#allocation9], 256  }
  0x1f   :  { %225 = vsyncadd [#allocation9], 4294967040  ;;  %v71_v0 = vld [vmem:[#allocation8 + $0x8] sm:$0xff]  ;;  %v70_v1 = vld [vmem:[#allocation8] sm:$0xff]  ;;  %vm72_vm0 = vcmask 130048   ;;  %s232_s2 = smov [#allocation10]  }
  0x20   :  { %93 = vmatpush.msra.mxu0 %v71_v0  ;;  %143 = vmatpush.msra.mxu1 %v71_v0  ;;  %v68_v2 = vld [vmem:[#allocation5] sm:$0xff]  ;;  %v69_v3 = vld [vmem:[#allocation5 + $0x8] sm:$0xff]  ;;  %s117_s17 = sshll.u32 %s232_s2, 4  ;;  %s119_s20 = sshll.u32 %s292_s3, 4  ;;  %s118_s17 = int_to_ptr.vmem [resolvable:$true] %s117_s17  ;;  %s120_s20 = int_to_ptr.hbm [resolvable:$true] %s119_s20 }
  0x22   :  { %94 = vmatpush.msra.mxu0 %v70_v1  ;;  %144 = vmatpush.msra.mxu1 %v70_v1 }
  0x23   :  { %140 = vmatmul.msk.f32.vlgmr.msra.gmra.mxu0 %vm72_vm0, %v68_v2  ;;  %141 = vmatmul.msk.f32.vlgmr.msra.gmra.mxu1 %vm72_vm0, %v69_v3 }
  0xa0   :  { %v96_v4 = vpop.f32.mrf.mxu0  ;;  %v99_v5 = vpop.f32.mrf.mxu1 }
  0xa1   :  { %111 = vst [vmem:[#allocation10] sm:$0xff] %v96_v4 }
  0xa2   :  { %112 = vst [vmem:[#allocation10 + $0x8] sm:$0xff] %v99_v5 }
  0xa3   :  { %125 = dma.vmem_to_hbm [thread:$0]  %s118_s17, 256, %s120_s20, [#allocation7], %s229_s4, %s229_s4, %s230_s5  }
  0xa4   :  { %226 = dma.done.wait [#allocation7], 256  }
  0xa5   :  { %227 = vsyncadd [#allocation7], 4294967040 }
  0xa6   :  { %130 = vsyncpa [#allocation6], 1 }
  0xa7   :  { %131 = vsyncpa [#allocation9], 1 }
  0xa8   :  { %132 = vsyncpa [#allocation7], 1 }

</bundles_post_ra>
